<compile_context>
chip_gen: v6e
topology: v6e:2x2x1
jax: 0.10.0
libtpu: 0.0.40
codegen_flags: <defaults>
</compile_context>

<pallas_src>
import jax
import jax.numpy as jnp
from jax import lax
from jax.experimental import pallas as pl
from jax.experimental.pallas import tpu as pltpu

_INV_SQRT2 = 0.7071067811865476
_BN_EPS = 1e-5


def _gelu(x):
    # exact GELU (PyTorch nn.GELU default, approximate='none')
    return 0.5 * x * (1.0 + lax.erf(x * _INV_SQRT2))


def _downblock_kernel(x_ref, w1_ref, b1_ref, w2_ref, b2_ref, w3_ref, b3_ref,
                      o_ref, xpad_ref, apad_ref):
    # x_ref : (1, Ho, 2*W*Cin)  paired input rows, channels-last, row-flattened
    # wK_ref: (T, K, Wo*Cout)   block-banded, BN-folded weights (T=2 for the stride-2
    #                           DownConv, T=3 for the stride-1 convs)
    # bK_ref: (1, Wo*Cout)      BN-folded bias, tiled over output columns
    # o_ref : (1, Ho, Wo*Cout)  lane-dense output rows
    # xpad_ref: (Ho+1, 2*W*Cin) VMEM scratch: row-padded layer-1 input
    # apad_ref: (Ho+2, Wo*Cout) VMEM scratch: row-padded intermediate activations
    npair = x_ref.shape[1]
    Ho = o_ref.shape[1]
    n_lanes = o_ref.shape[2]

    # In-kernel zero padding: zero the scratches (keeps the never-written border rows
    # zero and is megacore-safe), then copy the block interior.
    xpad_ref[...] = jnp.zeros_like(xpad_ref)
    apad_ref[...] = jnp.zeros_like(apad_ref)
    xpad_ref[pl.ds(1, npair), :] = x_ref[0]

    def band_conv(src_ref, w_ref, b_ref):
        # conv + BN + GELU as a sum of T fat matmuls; term t reads sublane offset t.
        acc = jnp.zeros((Ho, n_lanes), jnp.float32)
        for t in range(w_ref.shape[0]):
            lhs = src_ref[pl.ds(t, Ho), :]
            acc = acc + jnp.dot(lhs, w_ref[t],
                                preferred_element_type=jnp.float32)
        return _gelu(acc + b_ref[...])

    # Layer 1: DownConv (stride 2) — row stride is absorbed by the paired-row layout,
    # column stride + padding live in the band matrices.
    a = band_conv(xpad_ref, w1_ref, b1_ref)
    apad_ref[pl.ds(1, Ho), :] = a            # intermediate stays in VMEM

    # Layer 2: Conv (stride 1)
    a = band_conv(apad_ref, w2_ref, b2_ref)
    apad_ref[pl.ds(1, Ho), :] = a            # borders are still zero; only interior rewritten

    # Layer 3: Conv (stride 1)
    a = band_conv(apad_ref, w3_ref, b3_ref)
    o_ref[0] = a.astype(o_ref.dtype)


def _fold_bn(w, b, gamma, beta, mean, var, eps=_BN_EPS):
    # Fold eval-mode BatchNorm into the conv weights/bias.  w: (3,3,Cin,Cout) HWIO.
    scale = gamma / jnp.sqrt(var + eps)          # (Cout,)
    return w * scale, (b - mean) * scale + beta


def _col_band(w_row, w_in, stride):
    # Build the (W_in*Cin, W_out*Cout) block-banded matrix for one row tap (dy).
    # w_row: (kw, Cin, Cout) — the kw column taps.  Out-of-range taps (== zero column
    # padding) are simply dropped, and the column stride is baked into the band.
    kw, cin, cout = w_row.shape
    w_out = (w_in - 1) // stride + 1
    i = jnp.arange(w_in)
    x = jnp.arange(w_out)
    a = jnp.arange(kw)
    # sel[a, i, x] = 1 iff input column i feeds output column x via tap a
    sel = (i[None, :, None] == stride * x[None, None, :] + a[:, None, None] - 1)
    sel = sel.astype(w_row.dtype)
    band = jnp.einsum("aiw,aco->icwo", sel, w_row)
    return band.reshape(w_in * cin, w_out * cout)


def prepare_downblock(params, height, width):
    """Fold BN and build the band weight matrices ONCE (params are static per model)."""
    del height  # row handling is entirely in the kernel; only widths matter here
    wo = (width - 1) // 2 + 1

    def fold(layer):
        return _fold_bn(layer["w"], layer["b"], layer["gamma"], layer["beta"],
                        layer["mean"], layer["var"])

    # Layer 1 (DownConv, stride 2): paired-row formulation, 2 terms with K = 2*W*Cin.
    # term at sublane offset 0 multiplies [orig 2y-2, orig 2y-1] -> only dy=0 on the
    # right half; term at offset 1 multiplies [orig 2y, orig 2y+1] -> dy=1 / dy=2.
    w_eff, b_eff = fold(params[0])
    band0 = _col_band(w_eff[0], width, 2)
    band1 = _col_band(w_eff[1], width, 2)
    band2 = _col_band(w_eff[2], width, 2)
    zero = jnp.zeros_like(band0)
    w1 = jnp.stack([jnp.concatenate([zero, band0], axis=0),
                    jnp.concatenate([band1, band2], axis=0)])
    bias1 = jnp.tile(b_eff, (wo,))[None, :]

    # Layers 2 & 3 (stride 1): 3 terms each with K = Wo*Cout.
    def stride1(layer):
        w_eff, b_eff = fold(layer)
        w = jnp.stack([_col_band(w_eff[d], wo, 1) for d in range(3)])
        return w, jnp.tile(b_eff, (wo,))[None, :]

    w2, bias2 = stride1(params[1])
    w3, bias3 = stride1(params[2])
    return (w1, bias1, w2, bias2, w3, bias3)


@jax.jit
def downblock_forward(x_nchw, prepared):
    """DownBlock forward: DownConv(stride 2) -> Conv -> Conv.  NCHW in / NCHW out."""
    w1, b1, w2, b2, w3, b3 = prepared
    N, Cin, H, W = x_nchw.shape
    Ho = (H - 1) // 2 + 1
    Wo = (W - 1) // 2 + 1
    Cout = w2.shape[-1] // Wo

    # NCHW -> NHWC, then merge pairs of rows onto the lane axis (free reshape of the
    # already-needed layout transpose; NOT a polyphase materialization).
    x = jnp.transpose(x_nchw, (0, 2, 3, 1))
    if H % 2:  # make the row count even for the pairing (extra row == bottom zero pad)
        x = jnp.pad(x, ((0, 0), (0, 1), (0, 0), (0, 0)))
    Hp = x.shape[1]
    x = x.reshape(N, Hp // 2, 2 * W * Cin)

    out = pl.pallas_call(
        _downblock_kernel,
        out_shape=jax.ShapeDtypeStruct((N, Ho, Wo * Cout), x.dtype),
        grid_spec=pltpu.PrefetchScalarGridSpec(
            num_scalar_prefetch=0,
            grid=(N,),                      # one image per grid step; batch axis parallel
            in_specs=[
                pl.BlockSpec((1, Hp // 2, 2 * W * Cin), lambda n: (n, 0, 0)),
                pl.BlockSpec(w1.shape, lambda n: (0, 0, 0)),
                pl.BlockSpec(b1.shape, lambda n: (0, 0)),
                pl.BlockSpec(w2.shape, lambda n: (0, 0, 0)),
                pl.BlockSpec(b2.shape, lambda n: (0, 0)),
                pl.BlockSpec(w3.shape, lambda n: (0, 0, 0)),
                pl.BlockSpec(b3.shape, lambda n: (0, 0)),
            ],
            out_specs=pl.BlockSpec((1, Ho, Wo * Cout), lambda n: (n, 0, 0)),
            scratch_shapes=[
                pltpu.VMEM((Hp // 2 + 1, 2 * W * Cin), jnp.float32),  # padded layer-1 input
                pltpu.VMEM((Ho + 2, Wo * Cout), jnp.float32),         # padded intermediates
            ],
        ),
        compiler_params=pltpu.CompilerParams(
            dimension_semantics=("parallel",),
        ),
    )(x, w1, b1, w2, b2, w3, b3)

    out = out.reshape(N, Ho, Wo, Cout)
    return jnp.transpose(out, (0, 3, 1, 2))      # NHWC -> NCHW


def _reference(x_nchw, params):
    x = jnp.transpose(x_nchw, (0, 2, 3, 1))
    strides = (2, 1, 1)
    for layer, s in zip(params, strides):
        y = lax.conv_general_dilated(
            x, layer["w"], window_strides=(s, s), padding=((1, 1), (1, 1)),
            dimension_numbers=("NHWC", "HWIO", "NHWC"))
        y = y + layer["b"]
        y = (y - layer["mean"]) / jnp.sqrt(layer["var"] + _BN_EPS)
        y = y * layer["gamma"] + layer["beta"]
        x = _gelu(y)
    return jnp.transpose(x, (0, 3, 1, 2))


def _init_params(key, in_channels, out_channels):
    params = []
    cin = in_channels
    for _ in range(3):
        cout = out_channels
        key, kw, kb, kg, kbe, km, kv = jax.random.split(key, 7)
        params.append(dict(
            w=0.2 * jax.random.normal(kw, (3, 3, cin, cout), jnp.float32),
            b=0.1 * jax.random.normal(kb, (cout,), jnp.float32),
            gamma=1.0 + 0.1 * jax.random.normal(kg, (cout,), jnp.float32),
            beta=0.1 * jax.random.normal(kbe, (cout,), jnp.float32),
            mean=0.1 * jax.random.normal(km, (cout,), jnp.float32),
            var=0.5 + 0.2 * jnp.abs(jax.random.normal(kv, (cout,), jnp.float32)),
        ))
        cin = cout
    return params


if __name__ == "__main__":
    key = jax.random.PRNGKey(0)
    N, Cin, Cout, H, W = 2, 4, 16, 16, 16
    key, kx = jax.random.split(key)
    x = jax.random.normal(kx, (N, Cin, H, W), dtype=jnp.float32)
    params = _init_params(key, Cin, Cout)

    prepared = prepare_downblock(params, H, W)   # BN fold + band weights, done once
    y = downblock_forward(x, prepared)
    y = jax.block_until_ready(y)

    y_ref = _reference(x, params)
    assert y.shape == (N, Cout, H // 2, W // 2), y.shape
    max_err = float(jnp.max(jnp.abs(y - y_ref)))
    # tolerance accounts for the TPU MXU's default reduced-precision f32 matmul path
    assert jnp.allclose(y, y_ref, atol=2e-3, rtol=2e-3), max_err
    print("KERNEL_OK")
</pallas_src>

<mosaic_0001>
module attributes {stable_mosaic.version = 11 : i64} {
  func.func @_downblock_kernel(%arg0: i32, %arg1: memref<1x8x128xf32, #tpu.memory_space<vmem>>, %arg2: memref<2x128x128xf32, #tpu.memory_space<vmem>>, %arg3: memref<1x128xf32, #tpu.memory_space<vmem>>, %arg4: memref<3x128x128xf32, #tpu.memory_space<vmem>>, %arg5: memref<1x128xf32, #tpu.memory_space<vmem>>, %arg6: memref<3x128x128xf32, #tpu.memory_space<vmem>>, %arg7: memref<1x128xf32, #tpu.memory_space<vmem>>, %arg8: memref<1x8x128xf32, #tpu.memory_space<vmem>>, %arg9: memref<9x128xf32, #tpu.memory_space<vmem>>, %arg10: memref<10x128xf32, #tpu.memory_space<vmem>>) attributes {dimension_semantics = [#tpu.dimension_semantics<parallel>], iteration_bounds = array<i64: 2>, scalar_prefetch = 0 : i64, scratch_operands = 2 : i64, tpu.core_type = #tpu.core_type<tc>, window_params = [{transform_indices = @transform_0, window_bounds = array<i64: 1, 8, 128>}, {pipeline_mode = #tpu.pipeline_mode<synchronous>, transform_indices = @transform_1, window_bounds = array<i64: 2, 128, 128>}, {pipeline_mode = #tpu.pipeline_mode<synchronous>, transform_indices = @transform_2, window_bounds = array<i64: 1, 128>}, {pipeline_mode = #tpu.pipeline_mode<synchronous>, transform_indices = @transform_3, window_bounds = array<i64: 3, 128, 128>}, {pipeline_mode = #tpu.pipeline_mode<synchronous>, transform_indices = @transform_4, window_bounds = array<i64: 1, 128>}, {pipeline_mode = #tpu.pipeline_mode<synchronous>, transform_indices = @transform_5, window_bounds = array<i64: 3, 128, 128>}, {pipeline_mode = #tpu.pipeline_mode<synchronous>, transform_indices = @transform_6, window_bounds = array<i64: 1, 128>}, {transform_indices = @transform_7, window_bounds = array<i64: 1, 8, 128>}]} {
    %cst = arith.constant 0.000000e+00 : f32
    %0 = vector.broadcast %cst : f32 to vector<9x128xf32>
    %c0 = arith.constant 0 : index
    %c0_0 = arith.constant 0 : index
    %1 = vector.load %arg9[%c0, %c0_0] : memref<9x128xf32, #tpu.memory_space<vmem>>, vector<9x128xf32>
    tpu.vector_store %arg9[%c0, %c0_0], %0 {strides = array<i32>} : memref<9x128xf32, #tpu.memory_space<vmem>>, vector<9x128xf32>,
    %cst_1 = arith.constant 0.000000e+00 : f32
    %2 = vector.broadcast %cst_1 : f32 to vector<10x128xf32>
    %c0_2 = arith.constant 0 : index
    %c0_3 = arith.constant 0 : index
    %3 = vector.load %arg10[%c0_2, %c0_3] : memref<10x128xf32, #tpu.memory_space<vmem>>, vector<10x128xf32>
    tpu.vector_store %arg10[%c0_2, %c0_3], %2 {strides = array<i32>} : memref<10x128xf32, #tpu.memory_space<vmem>>, vector<10x128xf32>,
    %c0_4 = arith.constant 0 : index
    %c0_5 = arith.constant 0 : index
    %c0_6 = arith.constant 0 : index
    %4 = vector.load %arg1[%c0_4, %c0_5, %c0_6] : memref<1x8x128xf32, #tpu.memory_space<vmem>>, vector<1x8x128xf32>
    %5 = vector.shape_cast %4 : vector<1x8x128xf32> to vector<8x128xf32>
    %c1 = arith.constant 1 : index
    %c0_7 = arith.constant 0 : index
    %6 = vector.load %arg9[%c1, %c0_7] : memref<9x128xf32, #tpu.memory_space<vmem>>, vector<8x128xf32>
    tpu.vector_store %arg9[%c1, %c0_7], %5 {strides = array<i32>} : memref<9x128xf32, #tpu.memory_space<vmem>>, vector<8x128xf32>,
    %cst_8 = arith.constant 0.000000e+00 : f32
    %7 = vector.broadcast %cst_8 : f32 to vector<8x128xf32>
    %c0_9 = arith.constant 0 : index
    %c0_10 = arith.constant 0 : index
    %8 = vector.load %arg9[%c0_9, %c0_10] : memref<9x128xf32, #tpu.memory_space<vmem>>, vector<8x128xf32>
    %c0_11 = arith.constant 0 : index
    %c0_12 = arith.constant 0 : index
    %c0_13 = arith.constant 0 : index
    %9 = vector.load %arg2[%c0_11, %c0_12, %c0_13] : memref<2x128x128xf32, #tpu.memory_space<vmem>>, vector<1x128x128xf32>
    %10 = vector.shape_cast %9 : vector<1x128x128xf32> to vector<128x128xf32>
    %cst_14 = arith.constant dense<0.000000e+00> : vector<8x128xf32>
    %11 = tpu.matmul %8, %10, %cst_14 {dimension_numbers = #tpu.dot_dimension_numbers<[1], [0], [0], [1], [0, 0, 1, 1], [], []>} : vector<8x128xf32>, vector<128x128xf32>, vector<8x128xf32> -> vector<8x128xf32>
    %12 = arith.addf %7, %11 : vector<8x128xf32>
    %c1_15 = arith.constant 1 : index
    %c0_16 = arith.constant 0 : index
    %13 = vector.load %arg9[%c1_15, %c0_16] : memref<9x128xf32, #tpu.memory_space<vmem>>, vector<8x128xf32>
    %c1_17 = arith.constant 1 : index
    %c0_18 = arith.constant 0 : index
    %c0_19 = arith.constant 0 : index
    %14 = vector.load %arg2[%c1_17, %c0_18, %c0_19] : memref<2x128x128xf32, #tpu.memory_space<vmem>>, vector<1x128x128xf32>
    %15 = vector.shape_cast %14 : vector<1x128x128xf32> to vector<128x128xf32>
    %cst_20 = arith.constant dense<0.000000e+00> : vector<8x128xf32>
    %16 = tpu.matmul %13, %15, %cst_20 {dimension_numbers = #tpu.dot_dimension_numbers<[1], [0], [0], [1], [0, 0, 1, 1], [], []>} : vector<8x128xf32>, vector<128x128xf32>, vector<8x128xf32> -> vector<8x128xf32>
    %17 = arith.addf %12, %16 : vector<8x128xf32>
    %c0_21 = arith.constant 0 : index
    %c0_22 = arith.constant 0 : index
    %18 = vector.load %arg3[%c0_21, %c0_22] : memref<1x128xf32, #tpu.memory_space<vmem>>, vector<1x128xf32>
    %19 = vector.broadcast %18 : vector<1x128xf32> to vector<8x128xf32>
    %20 = arith.addf %17, %19 : vector<8x128xf32>
    %cst_23 = arith.constant 5.000000e-01 : f32
    %21 = vector.broadcast %cst_23 : f32 to vector<8x128xf32>
    %22 = arith.mulf %21, %20 : vector<8x128xf32>
    %cst_24 = arith.constant 0.707106769 : f32
    %23 = vector.broadcast %cst_24 : f32 to vector<8x128xf32>
    %24 = arith.mulf %20, %23 : vector<8x128xf32>
    %25 = math.erf %24 : vector<8x128xf32>
    %cst_25 = arith.constant 1.000000e+00 : f32
    %26 = vector.broadcast %cst_25 : f32 to vector<8x128xf32>
    %27 = arith.addf %26, %25 : vector<8x128xf32>
    %28 = arith.mulf %22, %27 : vector<8x128xf32>
    %c1_26 = arith.constant 1 : index
    %c0_27 = arith.constant 0 : index
    %29 = vector.load %arg10[%c1_26, %c0_27] : memref<10x128xf32, #tpu.memory_space<vmem>>, vector<8x128xf32>
    tpu.vector_store %arg10[%c1_26, %c0_27], %28 {strides = array<i32>} : memref<10x128xf32, #tpu.memory_space<vmem>>, vector<8x128xf32>,
    %cst_28 = arith.constant 0.000000e+00 : f32
    %30 = vector.broadcast %cst_28 : f32 to vector<8x128xf32>
    %c0_29 = arith.constant 0 : index
    %c0_30 = arith.constant 0 : index
    %31 = vector.load %arg10[%c0_29, %c0_30] : memref<10x128xf32, #tpu.memory_space<vmem>>, vector<8x128xf32>
    %c0_31 = arith.constant 0 : index
    %c0_32 = arith.constant 0 : index
    %c0_33 = arith.constant 0 : index
    %32 = vector.load %arg4[%c0_31, %c0_32, %c0_33] : memref<3x128x128xf32, #tpu.memory_space<vmem>>, vector<1x128x128xf32>
    %33 = vector.shape_cast %32 : vector<1x128x128xf32> to vector<128x128xf32>
    %cst_34 = arith.constant dense<0.000000e+00> : vector<8x128xf32>
    %34 = tpu.matmul %31, %33, %cst_34 {dimension_numbers = #tpu.dot_dimension_numbers<[1], [0], [0], [1], [0, 0, 1, 1], [], []>} : vector<8x128xf32>, vector<128x128xf32>, vector<8x128xf32> -> vector<8x128xf32>
    %35 = arith.addf %30, %34 : vector<8x128xf32>
    %c1_35 = arith.constant 1 : index
    %c0_36 = arith.constant 0 : index
    %36 = vector.load %arg10[%c1_35, %c0_36] : memref<10x128xf32, #tpu.memory_space<vmem>>, vector<8x128xf32>
    %c1_37 = arith.constant 1 : index
    %c0_38 = arith.constant 0 : index
    %c0_39 = arith.constant 0 : index
    %37 = vector.load %arg4[%c1_37, %c0_38, %c0_39] : memref<3x128x128xf32, #tpu.memory_space<vmem>>, vector<1x128x128xf32>
    %38 = vector.shape_cast %37 : vector<1x128x128xf32> to vector<128x128xf32>
    %cst_40 = arith.constant dense<0.000000e+00> : vector<8x128xf32>
    %39 = tpu.matmul %36, %38, %cst_40 {dimension_numbers = #tpu.dot_dimension_numbers<[1], [0], [0], [1], [0, 0, 1, 1], [], []>} : vector<8x128xf32>, vector<128x128xf32>, vector<8x128xf32> -> vector<8x128xf32>
    %40 = arith.addf %35, %39 : vector<8x128xf32>
    %c2 = arith.constant 2 : index
    %c0_41 = arith.constant 0 : index
    %41 = vector.load %arg10[%c2, %c0_41] : memref<10x128xf32, #tpu.memory_space<vmem>>, vector<8x128xf32>
    %c2_42 = arith.constant 2 : index
    %c0_43 = arith.constant 0 : index
    %c0_44 = arith.constant 0 : index
    %42 = vector.load %arg4[%c2_42, %c0_43, %c0_44] : memref<3x128x128xf32, #tpu.memory_space<vmem>>, vector<1x128x128xf32>
    %43 = vector.shape_cast %42 : vector<1x128x128xf32> to vector<128x128xf32>
    %cst_45 = arith.constant dense<0.000000e+00> : vector<8x128xf32>
    %44 = tpu.matmul %41, %43, %cst_45 {dimension_numbers = #tpu.dot_dimension_numbers<[1], [0], [0], [1], [0, 0, 1, 1], [], []>} : vector<8x128xf32>, vector<128x128xf32>, vector<8x128xf32> -> vector<8x128xf32>
    %45 = arith.addf %40, %44 : vector<8x128xf32>
    %c0_46 = arith.constant 0 : index
    %c0_47 = arith.constant 0 : index
    %46 = vector.load %arg5[%c0_46, %c0_47] : memref<1x128xf32, #tpu.memory_space<vmem>>, vector<1x128xf32>
    %47 = vector.broadcast %46 : vector<1x128xf32> to vector<8x128xf32>
    %48 = arith.addf %45, %47 : vector<8x128xf32>
    %cst_48 = arith.constant 5.000000e-01 : f32
    %49 = vector.broadcast %cst_48 : f32 to vector<8x128xf32>
    %50 = arith.mulf %49, %48 : vector<8x128xf32>
    %cst_49 = arith.constant 0.707106769 : f32
    %51 = vector.broadcast %cst_49 : f32 to vector<8x128xf32>
    %52 = arith.mulf %48, %51 : vector<8x128xf32>
    %53 = math.erf %52 : vector<8x128xf32>
    %cst_50 = arith.constant 1.000000e+00 : f32
    %54 = vector.broadcast %cst_50 : f32 to vector<8x128xf32>
    %55 = arith.addf %54, %53 : vector<8x128xf32>
    %56 = arith.mulf %50, %55 : vector<8x128xf32>
    %c1_51 = arith.constant 1 : index
    %c0_52 = arith.constant 0 : index
    %57 = vector.load %arg10[%c1_51, %c0_52] : memref<10x128xf32, #tpu.memory_space<vmem>>, vector<8x128xf32>
    tpu.vector_store %arg10[%c1_51, %c0_52], %56 {strides = array<i32>} : memref<10x128xf32, #tpu.memory_space<vmem>>, vector<8x128xf32>,
    %cst_53 = arith.constant 0.000000e+00 : f32
    %58 = vector.broadcast %cst_53 : f32 to vector<8x128xf32>
    %c0_54 = arith.constant 0 : index
    %c0_55 = arith.constant 0 : index
    %59 = vector.load %arg10[%c0_54, %c0_55] : memref<10x128xf32, #tpu.memory_space<vmem>>, vector<8x128xf32>
    %c0_56 = arith.constant 0 : index
    %c0_57 = arith.constant 0 : index
    %c0_58 = arith.constant 0 : index
    %60 = vector.load %arg6[%c0_56, %c0_57, %c0_58] : memref<3x128x128xf32, #tpu.memory_space<vmem>>, vector<1x128x128xf32>
    %61 = vector.shape_cast %60 : vector<1x128x128xf32> to vector<128x128xf32>
    %cst_59 = arith.constant dense<0.000000e+00> : vector<8x128xf32>
    %62 = tpu.matmul %59, %61, %cst_59 {dimension_numbers = #tpu.dot_dimension_numbers<[1], [0], [0], [1], [0, 0, 1, 1], [], []>} : vector<8x128xf32>, vector<128x128xf32>, vector<8x128xf32> -> vector<8x128xf32>
    %63 = arith.addf %58, %62 : vector<8x128xf32>
    %c1_60 = arith.constant 1 : index
    %c0_61 = arith.constant 0 : index
    %64 = vector.load %arg10[%c1_60, %c0_61] : memref<10x128xf32, #tpu.memory_space<vmem>>, vector<8x128xf32>
    %c1_62 = arith.constant 1 : index
    %c0_63 = arith.constant 0 : index
    %c0_64 = arith.constant 0 : index
    %65 = vector.load %arg6[%c1_62, %c0_63, %c0_64] : memref<3x128x128xf32, #tpu.memory_space<vmem>>, vector<1x128x128xf32>
    %66 = vector.shape_cast %65 : vector<1x128x128xf32> to vector<128x128xf32>
    %cst_65 = arith.constant dense<0.000000e+00> : vector<8x128xf32>
    %67 = tpu.matmul %64, %66, %cst_65 {dimension_numbers = #tpu.dot_dimension_numbers<[1], [0], [0], [1], [0, 0, 1, 1], [], []>} : vector<8x128xf32>, vector<128x128xf32>, vector<8x128xf32> -> vector<8x128xf32>
    %68 = arith.addf %63, %67 : vector<8x128xf32>
    %c2_66 = arith.constant 2 : index
    %c0_67 = arith.constant 0 : index
    %69 = vector.load %arg10[%c2_66, %c0_67] : memref<10x128xf32, #tpu.memory_space<vmem>>, vector<8x128xf32>
    %c2_68 = arith.constant 2 : index
    %c0_69 = arith.constant 0 : index
    %c0_70 = arith.constant 0 : index
    %70 = vector.load %arg6[%c2_68, %c0_69, %c0_70] : memref<3x128x128xf32, #tpu.memory_space<vmem>>, vector<1x128x128xf32>
    %71 = vector.shape_cast %70 : vector<1x128x128xf32> to vector<128x128xf32>
    %cst_71 = arith.constant dense<0.000000e+00> : vector<8x128xf32>
    %72 = tpu.matmul %69, %71, %cst_71 {dimension_numbers = #tpu.dot_dimension_numbers<[1], [0], [0], [1], [0, 0, 1, 1], [], []>} : vector<8x128xf32>, vector<128x128xf32>, vector<8x128xf32> -> vector<8x128xf32>
    %73 = arith.addf %68, %72 : vector<8x128xf32>
    %c0_72 = arith.constant 0 : index
    %c0_73 = arith.constant 0 : index
    %74 = vector.load %arg7[%c0_72, %c0_73] : memref<1x128xf32, #tpu.memory_space<vmem>>, vector<1x128xf32>
    %75 = vector.broadcast %74 : vector<1x128xf32> to vector<8x128xf32>
    %76 = arith.addf %73, %75 : vector<8x128xf32>
    %cst_74 = arith.constant 5.000000e-01 : f32
    %77 = vector.broadcast %cst_74 : f32 to vector<8x128xf32>
    %78 = arith.mulf %77, %76 : vector<8x128xf32>
    %cst_75 = arith.constant 0.707106769 : f32
    %79 = vector.broadcast %cst_75 : f32 to vector<8x128xf32>
    %80 = arith.mulf %76, %79 : vector<8x128xf32>
    %81 = math.erf %80 : vector<8x128xf32>
    %cst_76 = arith.constant 1.000000e+00 : f32
    %82 = vector.broadcast %cst_76 : f32 to vector<8x128xf32>
    %83 = arith.addf %82, %81 : vector<8x128xf32>
    %84 = arith.mulf %78, %83 : vector<8x128xf32>
    %c0_77 = arith.constant 0 : index
    %c0_78 = arith.constant 0 : index
    %c0_79 = arith.constant 0 : index
    %85 = vector.load %arg8[%c0_77, %c0_78, %c0_79] : memref<1x8x128xf32, #tpu.memory_space<vmem>>, vector<1x8x128xf32>
    %86 = vector.shape_cast %85 : vector<1x8x128xf32> to vector<8x128xf32>
    %87 = vector.shape_cast %84 : vector<8x128xf32> to vector<1x8x128xf32>
    tpu.vector_store %arg8[%c0_77, %c0_78, %c0_79], %87 {strides = array<i32>} : memref<1x8x128xf32, #tpu.memory_space<vmem>>, vector<1x8x128xf32>,
    return
  }
  func.func @transform_0(%arg0: i32) -> (i32, i32, i32) {
    %c0_i32 = arith.constant 0 : i32
    %c0_i32_0 = arith.constant 0 : i32
    %c0_i32_1 = arith.constant 0 : i32
    return %arg0, %c0_i32, %c0_i32_0 : i32, i32, i32
  }
  func.func @transform_1(%arg0: i32) -> (i32, i32, i32) {
    %c0_i32 = arith.constant 0 : i32
    %c0_i32_0 = arith.constant 0 : i32
    %c0_i32_1 = arith.constant 0 : i32
    %c0_i32_2 = arith.constant 0 : i32
    return %c0_i32, %c0_i32_0, %c0_i32_1 : i32, i32, i32
  }
  func.func @transform_2(%arg0: i32) -> (i32, i32) {
    %c0_i32 = arith.constant 0 : i32
    %c0_i32_0 = arith.constant 0 : i32
    %c0_i32_1 = arith.constant 0 : i32
    return %c0_i32, %c0_i32_0 : i32, i32
  }
  func.func @transform_3(%arg0: i32) -> (i32, i32, i32) {
    %c0_i32 = arith.constant 0 : i32
    %c0_i32_0 = arith.constant 0 : i32
    %c0_i32_1 = arith.constant 0 : i32
    %c0_i32_2 = arith.constant 0 : i32
    return %c0_i32, %c0_i32_0, %c0_i32_1 : i32, i32, i32
  }
  func.func @transform_4(%arg0: i32) -> (i32, i32) {
    %c0_i32 = arith.constant 0 : i32
    %c0_i32_0 = arith.constant 0 : i32
    %c0_i32_1 = arith.constant 0 : i32
    return %c0_i32, %c0_i32_0 : i32, i32
  }
  func.func @transform_5(%arg0: i32) -> (i32, i32, i32) {
    %c0_i32 = arith.constant 0 : i32
    %c0_i32_0 = arith.constant 0 : i32
    %c0_i32_1 = arith.constant 0 : i32
    %c0_i32_2 = arith.constant 0 : i32
    return %c0_i32, %c0_i32_0, %c0_i32_1 : i32, i32, i32
  }
  func.func @transform_6(%arg0: i32) -> (i32, i32) {
    %c0_i32 = arith.constant 0 : i32
    %c0_i32_0 = arith.constant 0 : i32
    %c0_i32_1 = arith.constant 0 : i32
    return %c0_i32, %c0_i32_0 : i32, i32
  }
  func.func @transform_7(%arg0: i32) -> (i32, i32, i32) {
    %c0_i32 = arith.constant 0 : i32
    %c0_i32_0 = arith.constant 0 : i32
    %c0_i32_1 = arith.constant 0 : i32
    return %arg0, %c0_i32, %c0_i32_0 : i32, i32, i32
  }
}

</mosaic_0001>

<bundles_post_ra>
// kernel: downblock_forward.1
= control target key start
LH: loop header
LB: loop body
LE: loop exit
PB: predicated region body
PF: predicated region fallthrough
CT: control target
= control target key end

     0   :  { %s1652_s24 = smov 0   ;;  %s2220_s0 = inlined_call_operand.vmem [shape: f32[2,8,128], index: 0, kind: input, shape index: {}]   ;;  %s2221_s1 = inlined_call_operand.vmem [shape: f32[2,128,128], index: 1, kind: input, shape index: {}]   ;;  %s2222_s2 = inlined_call_operand.vmem [shape: f32[1,128], index: 2, kind: input, shape index: {}]   ;;  %s2223_s3 = inlined_call_operand.vmem [shape: f32[3,128,128], index: 3, kind: input, shape index: {}]   ;;  %s2224_s4 = inlined_call_operand.vmem [shape: f32[1,128], index: 4, kind: input, shape index: {}]   ;;  %s2225_s5 = inlined_call_operand.vmem [shape: f32[3,128,128], index: 5, kind: input, shape index: {}]   ;;  %s2226_s6 = inlined_call_operand.vmem [shape: f32[1,128], index: 6, kind: input, shape index: {}]   ;;  %s2227_s7 = inlined_call_operand.vmem [shape: f32[2,8,128], index: 7, kind: output, shape index: {}]  }
   0x1 LB: > { %s1078_s25 = sadd.s32 4294967295, %s1608_s24   ;;  %p1082_p0 = scmp.ge.s32.totalorder %s1608_s24, 1  ;;  %s1608_s24 = sphi %s1652_s24, %s17_s24  }
   0x2   : > { %p236_p1 = scmp.lt.s32.totalorder %s1608_s24, 3 }
   0x4   : > { %p237_p2 = pnand %p1082_p0, %p236_p1 }
   0x5   : > { %p266_p3 = scmp.lt.s32.totalorder (!%p237_p2), %s1078_s25, 1 }
   0x6   : > { %240 = sbr.rel (%p237_p2) target bundleno = 761 (0x2f9), region = 48 }
   0xb   : > { %v1100_v0 = vld [vmem:[%s2221_s1 + $0xf8] sm:$0xff]  ;;  %v1610_v2 = vmov 0.0   ;;  %v1099_v3 = vld [vmem:[%s2221_s1 + $0xf0] sm:$0xff]  ;;  %s2229_s25 = smov (!%p266_p3, %s1078_s25), 1  ;;  %v1098_v5 = vld [vmem:[%s2221_s1 + $0xe8] sm:$0xff]  ;;  %vm1611_vm0 = vmmov 0  }
   0xc   : > { %v296_v1 = vld [vmem:[%s2221_s1 + $0x78] sm:$0xff]  ;;  %1306 = vmatprep.subr.mxu0 %v1610_v2  ;;  %274 = vst [vmem:[#allocation2] sm:$0xff] %v1610_v2  ;;  %276 = vst [vmem:[#allocation3] sm:$0xff] %v1610_v2  ;;  %1341 = vmatprep.subr.mxu1 %v1610_v2  ;;  %v295_v4 = vld [vmem:[%s2221_s1 + $0x70] sm:$0xff]  ;;  %s1083_s15 = sshll.u32 %s2229_s25, 3 }
   0xd   : > { %277 = vst [vmem:[#allocation3 + $0x8] sm:$0x3] %v1610_v2  ;;  %1307 = vmatpush3.msra.mxu0 %v1100_v0  ;;  %1342 = vmatpush3.msra.mxu1 %v296_v1  ;;  %v294_v6 = vld [vmem:[%s2221_s1 + $0x68] sm:$0xff]  ;;  %v1097_v7 = vld [vmem:[%s2221_s1 + $0xe0] sm:$0xff]  ;;  %v1096_v9 = vld [vmem:[%s2221_s1 + $0xd8] sm:$0xff]  ;;  %s269_s28 = scalar_lea.vmem %s2220_s0, %s1083_s15  ;;  %s273_s10 = scalar_lea.vmem %s2227_s7, %s1083_s15 }
   0xe   : > { %1308 = vmatprep.subr.mxu0 %v1610_v2  ;;  %1343 = vmatprep.subr.mxu1 %v1610_v2  ;;  %v293_v8 = vld [vmem:[%s2221_s1 + $0x60] sm:$0xff]  ;;  %v292_v10 = vld [vmem:[%s2221_s1 + $0x58] sm:$0xff]  ;;  %v1095_v11 = vld [vmem:[%s2221_s1 + $0xd0] sm:$0xff] }
   0xf   : > { %1309 = vmatpush3.msra.mxu0 %v1099_v3  ;;  %1344 = vmatpush3.msra.mxu1 %v295_v4  ;;  %v291_v12 = vld [vmem:[%s2221_s1 + $0x50] sm:$0xff]  ;;  %v1717_v13 = vld [vmem:[%s269_s28] sm:$0xff]  ;;  %v1094_v14 = vld [vmem:[%s2221_s1 + $0xc8] sm:$0xff] }
  0x10   : > { %1310 = vmatprep.subr.mxu0 %v1610_v2  ;;  %1345 = vmatprep.subr.mxu1 %v1610_v2  ;;  %v290_v15 = vld [vmem:[%s2221_s1 + $0x48] sm:$0xff]  ;;  %279 = vst [vmem:[#allocation2 + $0x1] sm:$0xff] %v1717_v13  ;;  %v1093_v16 = vld [vmem:[%s2221_s1 + $0xc0] sm:$0xff]  ;;  %v1092_v18 = vld [vmem:[%s2221_s1 + $0xb8] sm:$0xff] }
  0x11   : > { %1311 = vmatpush3.msra.mxu0 %v1098_v5  ;;  %1346 = vmatpush3.msra.mxu1 %v294_v6  ;;  %v289_v17 = vld [vmem:[%s2221_s1 + $0x40] sm:$0xff]  ;;  %v288_v19 = vld [vmem:[%s2221_s1 + $0x38] sm:$0xff]  ;;  %v1091_v20 = vld [vmem:[%s2221_s1 + $0xb0] sm:$0xff] }
  0x12   : > { %1312 = vmatprep.subr.mxu0 %v1610_v2  ;;  %1347 = vmatprep.subr.mxu1 %v1610_v2  ;;  %v287_v21 = vld [vmem:[%s2221_s1 + $0x30] sm:$0xff]  ;;  %v1090_v22 = vld [vmem:[%s2221_s1 + $0xa8] sm:$0xff]  ;;  %v1089_v24 = vld [vmem:[%s2221_s1 + $0xa0] sm:$0xff] }
  0x13   : > { %1313 = vmatpush3.msra.mxu0 %v1097_v7  ;;  %1348 = vmatpush3.msra.mxu1 %v293_v8  ;;  %v286_v23 = vld [vmem:[%s2221_s1 + $0x28] sm:$0xff]  ;;  %v285_v25 = vld [vmem:[%s2221_s1 + $0x20] sm:$0xff]  ;;  %v1088_v26 = vld [vmem:[%s2221_s1 + $0x98] sm:$0xff] }
  0x14   : > { %1314 = vmatprep.subr.mxu0 %v1610_v2  ;;  %1349 = vmatprep.subr.mxu1 %v1610_v2  ;;  %v284_v27 = vld [vmem:[%s2221_s1 + $0x18] sm:$0xff]  ;;  %v1087_v28 = vld [vmem:[%s2221_s1 + $0x90] sm:$0xff]  ;;  %v1086_v30 = vld [vmem:[%s2221_s1 + $0x88] sm:$0xff] }
  0x15   : > { %1315 = vmatpush3.msra.mxu0 %v1096_v9  ;;  %1350 = vmatpush3.msra.mxu1 %v292_v10  ;;  %v283_v29 = vld [vmem:[%s2221_s1 + $0x10] sm:$0xff]  ;;  %v282_v31 = vld [vmem:[%s2221_s1 + $0x8] sm:$0xff]  ;;  %v1085_v32 = vld [vmem:[%s2221_s1 + $0x80] sm:$0xff] }
  0x16   : > { %1316 = vmatprep.subr.mxu0 %v1610_v2  ;;  %1351 = vmatprep.subr.mxu1 %v1610_v2  ;;  %v281_v33 = vld [vmem:[%s2221_s1] sm:$0xff]  ;;  %v1117_v35 = vld [vmem:[%s2223_s3 + $0xf8] sm:$0xff]  ;;  %v1116_v36 = vld [vmem:[%s2223_s3 + $0xf0] sm:$0xff] }
  0x17   : > { %1317 = vmatpush3.msra.mxu0 %v1095_v11  ;;  %1352 = vmatpush3.msra.mxu1 %v291_v12  ;;  %v280_v34 = vld [vmem:[#allocation2] sm:$0xff]  ;;  %v1115_v37 = vld [vmem:[%s2223_s3 + $0xe8] sm:$0xff]  ;;  %v1113_v39 = vld [vmem:[%s2223_s3 + $0xd8] sm:$0xff] }
  0x18   : > { %1318 = vmatprep.subr.mxu0 %v1610_v2  ;;  %1353 = vmatprep.subr.mxu1 %v1610_v2  ;;  %v1114_v38 = vld [vmem:[%s2223_s3 + $0xe0] sm:$0xff]  ;;  %v485_v40 = vld [vmem:[%s2223_s3 + $0x78] sm:$0xff]  ;;  %v1112_v41 = vld [vmem:[%s2223_s3 + $0xd0] sm:$0xff] }
  0x19   : > { %1319 = vmatpush3.msra.mxu0 %v1094_v14  ;;  %1354 = vmatpush3.msra.mxu1 %v290_v15  ;;  %v484_v42 = vld [vmem:[%s2223_s3 + $0x70] sm:$0xff]  ;;  %v1111_v43 = vld [vmem:[%s2223_s3 + $0xc8] sm:$0xff]  ;;  %v1110_v45 = vld [vmem:[%s2223_s3 + $0xc0] sm:$0xff] }
  0x1a   : > { %1320 = vmatprep.subr.mxu0 %v1610_v2  ;;  %1355 = vmatprep.subr.mxu1 %v1610_v2  ;;  %v483_v44 = vld [vmem:[%s2223_s3 + $0x68] sm:$0xff]  ;;  %v482_v46 = vld [vmem:[%s2223_s3 + $0x60] sm:$0xff]  ;;  %v1109_v47 = vld [vmem:[%s2223_s3 + $0xb8] sm:$0xff] }
  0x1b   : > { %1321 = vmatpush3.msra.mxu0 %v1093_v16  ;;  %1356 = vmatpush3.msra.mxu1 %v289_v17  ;;  %v481_v48 = vld [vmem:[%s2223_s3 + $0x58] sm:$0xff]  ;;  %v1108_v49 = vld [vmem:[%s2223_s3 + $0xb0] sm:$0xff]  ;;  %v1107_v51 = vld [vmem:[%s2223_s3 + $0xa8] sm:$0xff] }
  0x1c   : > { %1322 = vmatprep.subr.mxu0 %v1610_v2  ;;  %1357 = vmatprep.subr.mxu1 %v1610_v2  ;;  %v480_v50 = vld [vmem:[%s2223_s3 + $0x50] sm:$0xff]  ;;  %v479_v52 = vld [vmem:[%s2223_s3 + $0x48] sm:$0xff]  ;;  %v1106_v53 = vld [vmem:[%s2223_s3 + $0xa0] sm:$0xff] }
  0x1d   : > { %1323 = vmatpush3.msra.mxu0 %v1092_v18  ;;  %1358 = vmatpush3.msra.mxu1 %v288_v19  ;;  %v478_v54 = vld [vmem:[%s2223_s3 + $0x40] sm:$0xff]  ;;  %v1105_v55 = vld [vmem:[%s2223_s3 + $0x98] sm:$0xff]  ;;  %v1104_v57 = vld [vmem:[%s2223_s3 + $0x90] sm:$0xff] }
  0x1e   : > { %1324 = vmatprep.subr.mxu0 %v1610_v2  ;;  %1359 = vmatprep.subr.mxu1 %v1610_v2  ;;  %v477_v56 = vld [vmem:[%s2223_s3 + $0x38] sm:$0xff]  ;;  %v476_v58 = vld [vmem:[%s2223_s3 + $0x30] sm:$0xff]  ;;  %v1103_v59 = vld [vmem:[%s2223_s3 + $0x88] sm:$0xff] }
  0x1f   : > { %1325 = vmatpush3.msra.mxu0 %v1091_v20  ;;  %1360 = vmatpush3.msra.mxu1 %v287_v21  ;;  %v475_v60 = vld [vmem:[%s2223_s3 + $0x28] sm:$0xff]  ;;  %v1102_v61 = vld [vmem:[%s2223_s3 + $0x80] sm:$0xff]  ;;  %v473_v63 = vld [vmem:[%s2223_s3 + $0x18] sm:$0xff] }
  0x20   : > { %1326 = vmatprep.subr.mxu0 %v1610_v2  ;;  %1361 = vmatprep.subr.mxu1 %v1610_v2  ;;  %v474_v62 = vld [vmem:[%s2223_s3 + $0x20] sm:$0xff]  ;;  %v472_v0 = vld [vmem:[%s2223_s3 + $0x10] sm:$0xff]  ;;  %v471_v1 = vld [vmem:[%s2223_s3 + $0x8] sm:$0xff] }
  0x21   : > { %1327 = vmatpush3.msra.mxu0 %v1090_v22  ;;  %1362 = vmatpush3.msra.mxu1 %v286_v23  ;;  %v470_v3 = vld [vmem:[%s2223_s3] sm:$0xff]  ;;  %v1133_v16 = vld [vmem:[%s2223_s3 + $0x178] sm:$0xff]  ;;  %v1132_v17 = vld [vmem:[%s2223_s3 + $0x170] sm:$0xff] }
  0x22   : > { %1328 = vmatprep.subr.mxu0 %v1610_v2  ;;  %1363 = vmatprep.subr.mxu1 %v1610_v2  ;;  %v1101_v6 = vld [vmem:[%s2222_s2] ss:$0 sm:$0xff]  ;;  %v1131_v18 = vld [vmem:[%s2223_s3 + $0x168] sm:$0xff]  ;;  %v1129_v20 = vld [vmem:[%s2223_s3 + $0x158] sm:$0xff] }
  0x23   : > { %1329 = vmatpush3.msra.mxu0 %v1089_v24  ;;  %1364 = vmatpush3.msra.mxu1 %v285_v25  ;;  %v1130_v19 = vld [vmem:[%s2223_s3 + $0x160] sm:$0xff]  ;;  %v1128_v22 = vld [vmem:[%s2223_s3 + $0x150] sm:$0xff]  ;;  %v1127_v23 = vld [vmem:[%s2223_s3 + $0x148] sm:$0xff] }
  0x24   : > { %1330 = vmatprep.subr.mxu0 %v1610_v2  ;;  %1365 = vmatprep.subr.mxu1 %v1610_v2  ;;  %v1126_v24 = vld [vmem:[%s2223_s3 + $0x140] sm:$0xff]  ;;  %v1125_v25 = vld [vmem:[%s2223_s3 + $0x138] sm:$0xff] }
  0x25   : > { %1331 = vmatpush3.msra.mxu0 %v1088_v26  ;;  %1366 = vmatpush3.msra.mxu1 %v284_v27  ;;  %v1124_v26 = vld [vmem:[%s2223_s3 + $0x130] sm:$0xff]  ;;  %v1123_v27 = vld [vmem:[%s2223_s3 + $0x128] sm:$0xff] }
  0x26   : > { %1332 = vmatprep.subr.mxu0 %v1610_v2  ;;  %1367 = vmatprep.subr.mxu1 %v1610_v2 }
  0x27   : > { %1333 = vmatpush3.msra.mxu0 %v1087_v28  ;;  %1368 = vmatpush3.msra.mxu1 %v283_v29  ;;  %v1122_v28 = vld [vmem:[%s2223_s3 + $0x120] sm:$0xff]  ;;  %v1121_v29 = vld [vmem:[%s2223_s3 + $0x118] sm:$0xff] }
  0x28   : > { %1334 = vmatprep.subr.mxu0 %v1610_v2  ;;  %1369 = vmatprep.subr.mxu1 %v1610_v2 }
  0x29   : > { %1335 = vmatpush3.msra.mxu0 %v1086_v30  ;;  %1370 = vmatpush3.msra.mxu1 %v282_v31  ;;  %v1120_v30 = vld [vmem:[%s2223_s3 + $0x110] sm:$0xff]  ;;  %v1119_v31 = vld [vmem:[%s2223_s3 + $0x108] sm:$0xff] }
  0x2a   : > { %1336 = vmatprep.subr.mxu0 %v1610_v2  ;;  %1371 = vmatprep.subr.mxu1 %v1610_v2 }
  0x2b   : > { %1337 = vmatpush3.msra.mxu0 %v1085_v32  ;;  %1338 = vmatprep.mubr.msk.f32.mxu0 %vm1611_vm0, %v1610_v2  ;;  %v1118_v32 = vld [vmem:[%s2223_s3 + $0x100] sm:$0xff] }
  0x2c   : > { %1372 = vmatpush3.msra.mxu1 %v281_v33  ;;  %1373 = vmatprep.mubr.msk.f32.mxu1 %vm1611_vm0, %v1610_v2 }
  0x2d   : > { %1339 = vmatmul.mubr.f32.vlgmr.msra.gmra.mxu0 %v1717_v13  ;;  %1374 = vmatmul.mubr.f32.vlgmr.msra.gmra.mxu1 %v280_v34  ;;  %v1150_v34 = vld [vmem:[%s2225_s5 + $0xf8] sm:$0xff] }
  0x2e   : > { %1376 = vmatprep.subr.mxu0 %v1610_v2  ;;  %1411 = vmatprep.subr.mxu1 %v1610_v2 }
  0x2f   : > { %1408 = vmatprep.mubr.msk.f32.mxu0 %vm1611_vm0, %v1610_v2  ;;  %1443 = vmatprep.mubr.msk.f32.mxu1 %vm1611_vm0, %v1610_v2 }
  0x30   : > { %1377 = vmatpush3.msra.mxu0 %v1117_v35  ;;  %1412 = vmatpush3.msra.mxu1 %v485_v40  ;;  %v1149_v35 = vld [vmem:[%s2225_s5 + $0xf0] sm:$0xff] }
  0x31   : > { %1378 = vmatprep.subr.mxu0 %v1610_v2  ;;  %1413 = vmatprep.subr.mxu1 %v1610_v2  ;;  %v1145_v40 = vld [vmem:[%s2225_s5 + $0xd0] sm:$0xff] }
  0x32   : > { %1379 = vmatpush3.msra.mxu0 %v1116_v36  ;;  %1414 = vmatpush3.msra.mxu1 %v484_v42  ;;  %v1148_v36 = vld [vmem:[%s2225_s5 + $0xe8] sm:$0xff] }
  0x33   : > { %1380 = vmatprep.subr.mxu0 %v1610_v2  ;;  %1415 = vmatprep.subr.mxu1 %v1610_v2  ;;  %v1144_v42 = vld [vmem:[%s2225_s5 + $0xc8] sm:$0xff] }
  0x34   : > { %1381 = vmatpush3.msra.mxu0 %v1115_v37  ;;  %1416 = vmatpush3.msra.mxu1 %v483_v44  ;;  %v1147_v37 = vld [vmem:[%s2225_s5 + $0xe0] sm:$0xff] }
  0x35   : > { %1382 = vmatprep.subr.mxu0 %v1610_v2  ;;  %1417 = vmatprep.subr.mxu1 %v1610_v2  ;;  %v1143_v44 = vld [vmem:[%s2225_s5 + $0xc0] sm:$0xff] }
  0x36   : > { %1383 = vmatpush3.msra.mxu0 %v1114_v38  ;;  %1418 = vmatpush3.msra.mxu1 %v482_v46  ;;  %v1146_v38 = vld [vmem:[%s2225_s5 + $0xd8] sm:$0xff] }
  0x37   : > { %1384 = vmatprep.subr.mxu0 %v1610_v2  ;;  %1419 = vmatprep.subr.mxu1 %v1610_v2  ;;  %v1142_v46 = vld [vmem:[%s2225_s5 + $0xb8] sm:$0xff] }
  0x38   : > { %1385 = vmatpush3.msra.mxu0 %v1113_v39  ;;  %1420 = vmatpush3.msra.mxu1 %v481_v48  ;;  %v763_v39 = vld [vmem:[%s2225_s5 + $0x78] sm:$0xff]  ;;  %v1141_v48 = vld [vmem:[%s2225_s5 + $0xb0] sm:$0xff] }
  0x39   : > { %1386 = vmatprep.subr.mxu0 %v1610_v2  ;;  %1421 = vmatprep.subr.mxu1 %v1610_v2 }
  0x3a   : > { %1387 = vmatpush3.msra.mxu0 %v1112_v41  ;;  %1422 = vmatpush3.msra.mxu1 %v480_v50  ;;  %v762_v41 = vld [vmem:[%s2225_s5 + $0x70] sm:$0xff]  ;;  %v1140_v50 = vld [vmem:[%s2225_s5 + $0xa8] sm:$0xff] }
  0x3b   : > { %1388 = vmatprep.subr.mxu0 %v1610_v2  ;;  %1423 = vmatprep.subr.mxu1 %v1610_v2 }
  0x3c   : > { %1389 = vmatpush3.msra.mxu0 %v1111_v43  ;;  %1424 = vmatpush3.msra.mxu1 %v479_v52  ;;  %v761_v43 = vld [vmem:[%s2225_s5 + $0x68] sm:$0xff]  ;;  %v1139_v52 = vld [vmem:[%s2225_s5 + $0xa0] sm:$0xff] }
  0x3d   : > { %1390 = vmatprep.subr.mxu0 %v1610_v2  ;;  %1425 = vmatprep.subr.mxu1 %v1610_v2 }
  0x3e   : > { %1391 = vmatpush3.msra.mxu0 %v1110_v45  ;;  %1426 = vmatpush3.msra.mxu1 %v478_v54  ;;  %v760_v45 = vld [vmem:[%s2225_s5 + $0x60] sm:$0xff]  ;;  %v1138_v54 = vld [vmem:[%s2225_s5 + $0x98] sm:$0xff] }
  0x3f   : > { %1392 = vmatprep.subr.mxu0 %v1610_v2  ;;  %1427 = vmatprep.subr.mxu1 %v1610_v2 }
  0x40   : > { %1393 = vmatpush3.msra.mxu0 %v1109_v47  ;;  %1428 = vmatpush3.msra.mxu1 %v477_v56  ;;  %v759_v47 = vld [vmem:[%s2225_s5 + $0x58] sm:$0xff]  ;;  %v1137_v56 = vld [vmem:[%s2225_s5 + $0x90] sm:$0xff] }
  0x41   : > { %1394 = vmatprep.subr.mxu0 %v1610_v2  ;;  %1429 = vmatprep.subr.mxu1 %v1610_v2 }
  0x42   : > { %1395 = vmatpush3.msra.mxu0 %v1108_v49  ;;  %1430 = vmatpush3.msra.mxu1 %v476_v58  ;;  %v758_v49 = vld [vmem:[%s2225_s5 + $0x50] sm:$0xff]  ;;  %v1136_v58 = vld [vmem:[%s2225_s5 + $0x88] sm:$0xff] }
  0x43   : > { %1396 = vmatprep.subr.mxu0 %v1610_v2  ;;  %1431 = vmatprep.subr.mxu1 %v1610_v2 }
  0x44   : > { %1397 = vmatpush3.msra.mxu0 %v1107_v51  ;;  %1432 = vmatpush3.msra.mxu1 %v475_v60  ;;  %v757_v51 = vld [vmem:[%s2225_s5 + $0x48] sm:$0xff]  ;;  %v1135_v60 = vld [vmem:[%s2225_s5 + $0x80] sm:$0xff] }
  0x45   : > { %1398 = vmatprep.subr.mxu0 %v1610_v2  ;;  %1433 = vmatprep.subr.mxu1 %v1610_v2 }
  0x46   : > { %1399 = vmatpush3.msra.mxu0 %v1106_v53  ;;  %1434 = vmatpush3.msra.mxu1 %v474_v62  ;;  %v756_v53 = vld [vmem:[%s2225_s5 + $0x40] sm:$0xff]  ;;  %v751_v62 = vld [vmem:[%s2225_s5 + $0x18] sm:$0xff] }
  0x47   : > { %1400 = vmatprep.subr.mxu0 %v1610_v2  ;;  %1435 = vmatprep.subr.mxu1 %v1610_v2 }
  0x48   : > { %1401 = vmatpush3.msra.mxu0 %v1105_v55  ;;  %1436 = vmatpush3.msra.mxu1 %v473_v63  ;;  %v755_v55 = vld [vmem:[%s2225_s5 + $0x38] sm:$0xff]  ;;  %v750_v63 = vld [vmem:[%s2225_s5 + $0x10] sm:$0xff] }
  0x49   : > { %1402 = vmatprep.subr.mxu0 %v1610_v2  ;;  %1437 = vmatprep.subr.mxu1 %v1610_v2 }
  0x4a   : > { %1403 = vmatpush3.msra.mxu0 %v1104_v57  ;;  %1438 = vmatpush3.msra.mxu1 %v472_v0  ;;  %v754_v57 = vld [vmem:[%s2225_s5 + $0x30] sm:$0xff]  ;;  %v749_v0 = vld [vmem:[%s2225_s5 + $0x8] sm:$0xff] }
  0x4b   : > { %1404 = vmatprep.subr.mxu0 %v1610_v2  ;;  %1439 = vmatprep.subr.mxu1 %v1610_v2 }
  0x4c   : > { %1405 = vmatpush3.msra.mxu0 %v1103_v59  ;;  %1440 = vmatpush3.msra.mxu1 %v471_v1  ;;  %v753_v59 = vld [vmem:[%s2225_s5 + $0x28] sm:$0xff]  ;;  %v748_v1 = vld [vmem:[%s2225_s5] sm:$0xff] }
  0x4d   : > { %1406 = vmatprep.subr.mxu0 %v1610_v2  ;;  %1441 = vmatprep.subr.mxu1 %v1610_v2 }
  0x4e   : > { %1407 = vmatpush3.msra.mxu0 %v1102_v61  ;;  %1442 = vmatpush3.msra.mxu1 %v470_v3  ;;  %v752_v61 = vld [vmem:[%s2225_s5 + $0x20] sm:$0xff] }
  0x4f   : > { %1446 = vmatprep.subr.mxu0 %v1610_v2  ;;  %1481 = vmatprep.subr.mxu1 %v1610_v2 }
  0xed   : > { %v381_v4 = vpop.f32.mrf.mxu0  ;;  %v451_v5 = vpop.f32.mrf.mxu1 }
  0xee   : > { %v452_v7 = vadd.f32 %v451_v5, %v381_v4 }
  0xef   : > { %v1340_v8 = vpop.f32.mrf.mxu0  ;;  %v1375_v9 = vpop.f32.mrf.mxu1 }
  0xf0   : > { %v462_v10 = vadd.f32 %v1101_v6, %v452_v7  ;;  %v1134_v9 = vld [vmem:[%s2224_s4] ss:$0 sm:$0xff] }
  0xf2   : > { %v464_v11 = vmul.f32 0.70710677, %v462_v10  ;;  %v463_v13 = vmul.f32 0.5, %v462_v10 }
  0xf4   : > { %1596 = verf.f32 %v464_v11 }
 0x101   : > { %v1597_v12 = vpop.eup %1596 }
 0x102   : > { %v466_v14 = vadd.f32 1.0, %v1597_v12 }
 0x104   : > { %v467_v15 = vmul.f32 %v466_v14, %v463_v13 }
 0x106   : > { %468 = vst [vmem:[#allocation3 + $0x1] sm:$0xff] %v467_v15  ;;  %1409 = vmatmul.mubr.f32.vlgmr.msra.gmra.mxu0 %v467_v15 }
 0x107   : > { %1447 = vmatpush3.msra.mxu0 %v1133_v16  ;;  %1478 = vmatprep.mubr.msk.f32.mxu0 %vm1611_vm0, %v1610_v2 }
 0x108   : > { %1448 = vmatprep.subr.mxu0 %v1610_v2 }
 0x109   : > { %1449 = vmatpush3.msra.mxu0 %v1132_v17 }
 0x10a   : > { %1450 = vmatprep.subr.mxu0 %v1610_v2 }
 0x10b   : > { %1451 = vmatpush3.msra.mxu0 %v1131_v18  ;;  %v1166_v18 = vld [vmem:[%s2225_s5 + $0x178] sm:$0xff] }
 0x10c   : > { %1452 = vmatprep.subr.mxu0 %v1610_v2 }
 0x10d   : > { %v469_v21 = vld [vmem:[#allocation3] sm:$0xff]  ;;  %1453 = vmatpush3.msra.mxu0 %v1130_v19 }
 0x10e   : > { %1444 = vmatmul.mubr.f32.vlgmr.msra.gmra.mxu1 %v469_v21  ;;  %1454 = vmatprep.subr.mxu0 %v1610_v2  ;;  %v644_v33 = vld [vmem:[#allocation3 + $0x2] sm:$0xff]  ;;  %v1163_v21 = vld [vmem:[%s2225_s5 + $0x160] sm:$0xff] }
 0x10f   : > { %1455 = vmatpush3.msra.mxu0 %v1129_v20  ;;  %1513 = vmatprep.mubr.msk.f32.mxu1 %vm1611_vm0, %v1610_v2  ;;  %v1165_v19 = vld [vmem:[%s2225_s5 + $0x170] sm:$0xff]  ;;  %v1164_v20 = vld [vmem:[%s2225_s5 + $0x168] sm:$0xff] }
 0x110   : > { %1456 = vmatprep.subr.mxu0 %v1610_v2  ;;  %1482 = vmatpush3.msra.mxu1 %v1150_v34  ;;  %v1151_v34 = vld [vmem:[%s2225_s5 + $0x100] sm:$0xff] }
 0x111   : > { %1457 = vmatpush3.msra.mxu0 %v1128_v22  ;;  %1483 = vmatprep.subr.mxu1 %v1610_v2  ;;  %v1162_v22 = vld [vmem:[%s2225_s5 + $0x158] sm:$0xff] }
 0x112   : > { %1458 = vmatprep.subr.mxu0 %v1610_v2  ;;  %1484 = vmatpush3.msra.mxu1 %v1149_v35 }
 0x113   : > { %1459 = vmatpush3.msra.mxu0 %v1127_v23  ;;  %1485 = vmatprep.subr.mxu1 %v1610_v2 }
 0x114   : > { %1460 = vmatprep.subr.mxu0 %v1610_v2  ;;  %1486 = vmatpush3.msra.mxu1 %v1148_v36 }
 0x115   : > { %1461 = vmatpush3.msra.mxu0 %v1126_v24  ;;  %1487 = vmatprep.subr.mxu1 %v1610_v2  ;;  %v1161_v24 = vld [vmem:[%s2225_s5 + $0x150] sm:$0xff] }
 0x116   : > { %1462 = vmatprep.subr.mxu0 %v1610_v2  ;;  %1488 = vmatpush3.msra.mxu1 %v1147_v37 }
 0x117   : > { %1463 = vmatpush3.msra.mxu0 %v1125_v25  ;;  %1489 = vmatprep.subr.mxu1 %v1610_v2  ;;  %v1160_v25 = vld [vmem:[%s2225_s5 + $0x148] sm:$0xff] }
 0x118   : > { %1464 = vmatprep.subr.mxu0 %v1610_v2  ;;  %1490 = vmatpush3.msra.mxu1 %v1146_v38 }
 0x119   : > { %1465 = vmatpush3.msra.mxu0 %v1124_v26  ;;  %1491 = vmatprep.subr.mxu1 %v1610_v2  ;;  %v1159_v26 = vld [vmem:[%s2225_s5 + $0x140] sm:$0xff] }
 0x11a   : > { %1466 = vmatprep.subr.mxu0 %v1610_v2  ;;  %1492 = vmatpush3.msra.mxu1 %v1145_v40 }
 0x11b   : > { %1467 = vmatpush3.msra.mxu0 %v1123_v27  ;;  %1493 = vmatprep.subr.mxu1 %v1610_v2  ;;  %v1158_v27 = vld [vmem:[%s2225_s5 + $0x138] sm:$0xff] }
 0x11c   : > { %1468 = vmatprep.subr.mxu0 %v1610_v2  ;;  %1494 = vmatpush3.msra.mxu1 %v1144_v42  ;;  %v1167_v42 = vld [vmem:[%s2226_s6] ss:$0 sm:$0xff] }
 0x11d   : > { %1469 = vmatpush3.msra.mxu0 %v1122_v28  ;;  %1495 = vmatprep.subr.mxu1 %v1610_v2  ;;  %v1157_v28 = vld [vmem:[%s2225_s5 + $0x130] sm:$0xff] }
 0x11e   : > { %1470 = vmatprep.subr.mxu0 %v1610_v2  ;;  %1496 = vmatpush3.msra.mxu1 %v1143_v44 }
 0x11f   : > { %1471 = vmatpush3.msra.mxu0 %v1121_v29  ;;  %1497 = vmatprep.subr.mxu1 %v1610_v2  ;;  %v1156_v29 = vld [vmem:[%s2225_s5 + $0x128] sm:$0xff] }
 0x120   : > { %1472 = vmatprep.subr.mxu0 %v1610_v2  ;;  %1498 = vmatpush3.msra.mxu1 %v1142_v46 }
 0x121   : > { %1473 = vmatpush3.msra.mxu0 %v1120_v30  ;;  %1499 = vmatprep.subr.mxu1 %v1610_v2  ;;  %v1155_v30 = vld [vmem:[%s2225_s5 + $0x120] sm:$0xff] }
 0x122   : > { %1474 = vmatprep.subr.mxu0 %v1610_v2  ;;  %1500 = vmatpush3.msra.mxu1 %v1141_v48 }
 0x123   : > { %1475 = vmatpush3.msra.mxu0 %v1119_v31  ;;  %1501 = vmatprep.subr.mxu1 %v1610_v2  ;;  %v1154_v31 = vld [vmem:[%s2225_s5 + $0x118] sm:$0xff] }
 0x124   : > { %1476 = vmatprep.subr.mxu0 %v1610_v2  ;;  %1502 = vmatpush3.msra.mxu1 %v1140_v50 }
 0x125   : > { %1477 = vmatpush3.msra.mxu0 %v1118_v32  ;;  %1503 = vmatprep.subr.mxu1 %v1610_v2  ;;  %v1153_v32 = vld [vmem:[%s2225_s5 + $0x110] sm:$0xff] }
 0x126   : > { %1479 = vmatmul.mubr.f32.vlgmr.msra.gmra.mxu0 %v644_v33  ;;  %1516 = vmatprep.subr.mxu0 %v1610_v2  ;;  %v1152_v33 = vld [vmem:[%s2225_s5 + $0x108] sm:$0xff] }
 0x127   : > { %1548 = vmatprep.mubr.msk.f32.mxu0 %vm1611_vm0, %v1610_v2  ;;  %1517 = vmatpush3.msra.mxu0 %v763_v39 }
 0x128   : > { %1518 = vmatprep.subr.mxu0 %v1610_v2  ;;  %1504 = vmatpush3.msra.mxu1 %v1139_v52 }
 0x129   : > { %1519 = vmatpush3.msra.mxu0 %v762_v41  ;;  %1505 = vmatprep.subr.mxu1 %v1610_v2 }
 0x12a   : > { %1520 = vmatprep.subr.mxu0 %v1610_v2  ;;  %1506 = vmatpush3.msra.mxu1 %v1138_v54 }
 0x12b   : > { %1521 = vmatpush3.msra.mxu0 %v761_v43  ;;  %1507 = vmatprep.subr.mxu1 %v1610_v2 }
 0x12c   : > { %1522 = vmatprep.subr.mxu0 %v1610_v2  ;;  %1508 = vmatpush3.msra.mxu1 %v1137_v56 }
 0x12d   : > { %1523 = vmatpush3.msra.mxu0 %v760_v45  ;;  %1509 = vmatprep.subr.mxu1 %v1610_v2 }
 0x12e   : > { %1524 = vmatprep.subr.mxu0 %v1610_v2  ;;  %1510 = vmatpush3.msra.mxu1 %v1136_v58 }
 0x12f   : > { %1525 = vmatpush3.msra.mxu0 %v759_v47  ;;  %1511 = vmatprep.subr.mxu1 %v1610_v2 }
 0x130   : > { %1526 = vmatprep.subr.mxu0 %v1610_v2  ;;  %1512 = vmatpush3.msra.mxu1 %v1135_v60 }
 0x131   : > { %1527 = vmatpush3.msra.mxu0 %v758_v49  ;;  %1551 = vmatprep.subr.mxu1 %v1610_v2 }
 0x132   : > { %1528 = vmatprep.subr.mxu0 %v1610_v2 }
 0x133   : > { %1529 = vmatpush3.msra.mxu0 %v757_v51 }
 0x134   : > { %1530 = vmatprep.subr.mxu0 %v1610_v2 }
 0x135   : > { %1531 = vmatpush3.msra.mxu0 %v756_v53 }
 0x136   : > { %1532 = vmatprep.subr.mxu0 %v1610_v2 }
 0x137   : > { %1533 = vmatpush3.msra.mxu0 %v755_v55 }
 0x138   : > { %1534 = vmatprep.subr.mxu0 %v1610_v2 }
 0x139   : > { %1535 = vmatpush3.msra.mxu0 %v754_v57 }
 0x13a   : > { %1536 = vmatprep.subr.mxu0 %v1610_v2 }
 0x13b   : > { %1537 = vmatpush3.msra.mxu0 %v753_v59 }
 0x13c   : > { %1538 = vmatprep.subr.mxu0 %v1610_v2 }
 0x13d   : > { %1539 = vmatpush3.msra.mxu0 %v752_v61 }
 0x13e   : > { %1540 = vmatprep.subr.mxu0 %v1610_v2 }
 0x13f   : > { %1541 = vmatpush3.msra.mxu0 %v751_v62 }
 0x140   : > { %1542 = vmatprep.subr.mxu0 %v1610_v2 }
 0x141   : > { %1543 = vmatpush3.msra.mxu0 %v750_v63 }
 0x142   : > { %1544 = vmatprep.subr.mxu0 %v1610_v2 }
 0x143   : > { %1545 = vmatpush3.msra.mxu0 %v749_v0 }
 0x144   : > { %1546 = vmatprep.subr.mxu0 %v1610_v2 }
 0x145   : > { %1547 = vmatpush3.msra.mxu0 %v748_v1 }
 0x1c6   : > { %v570_v3 = vpop.f32.mrf.mxu0 }
 0x1c8   : > { %v1410_v4 = vpop.f32.mrf.mxu0 }
 0x1ce   : > { %v640_v5 = vpop.f32.mrf.mxu1 }
 0x1cf   : > { %v641_v7 = vadd.f32 %v640_v5, %v570_v3 }
 0x1d0   : > { %v1445_v6 = vpop.f32.mrf.mxu1 }
 0x1e6   : > { %v728_v8 = vpop.f32.mrf.mxu0 }
 0x1e7   : > { %v732_v10 = vadd.f32 %v728_v8, %v641_v7 }
 0x1e8   : > { %v1480_v11 = vpop.f32.mrf.mxu0 }
 0x1e9   : > { %v740_v12 = vadd.f32 %v1134_v9, %v732_v10 }
 0x1eb   : > { %v742_v13 = vmul.f32 0.70710677, %v740_v12  ;;  %v741_v15 = vmul.f32 0.5, %v740_v12 }
 0x1ed   : > { %1598 = verf.f32 %v742_v13 }
 0x1fa   : > { %v1599_v14 = vpop.eup %1598 }
 0x1fb   : > { %v744_v16 = vadd.f32 1.0, %v1599_v14 }
 0x1fd   : > { %v745_v17 = vmul.f32 %v744_v16, %v741_v15 }
 0x1ff   : > { %746 = vst [vmem:[#allocation3 + $0x1] sm:$0xff] %v745_v17  ;;  %1514 = vmatmul.mubr.f32.vlgmr.msra.gmra.mxu1 %v745_v17 }
 0x200   : > { %1552 = vmatpush3.msra.mxu1 %v1166_v18  ;;  %1583 = vmatprep.mubr.msk.f32.mxu1 %vm1611_vm0, %v1610_v2 }
 0x201   : > { %1553 = vmatprep.subr.mxu1 %v1610_v2 }
 0x202   : > { %1554 = vmatpush3.msra.mxu1 %v1165_v19 }
 0x203   : > { %1555 = vmatprep.subr.mxu1 %v1610_v2 }
 0x204   : > { %1556 = vmatpush3.msra.mxu1 %v1164_v20 }
 0x205   : > { %1557 = vmatprep.subr.mxu1 %v1610_v2 }
 0x206   : > { %v747_v23 = vld [vmem:[#allocation3] sm:$0xff]  ;;  %1558 = vmatpush3.msra.mxu1 %v1163_v21 }
 0x207   : > { %1549 = vmatmul.mubr.f32.vlgmr.msra.gmra.mxu0 %v747_v23  ;;  %1559 = vmatprep.subr.mxu1 %v1610_v2  ;;  %v922_v35 = vld [vmem:[#allocation3 + $0x2] sm:$0xff] }
 0x208   : > { %1560 = vmatpush3.msra.mxu1 %v1162_v22 }
 0x209   : > { %1561 = vmatprep.subr.mxu1 %v1610_v2 }
 0x20a   : > { %1562 = vmatpush3.msra.mxu1 %v1161_v24 }
 0x20b   : > { %1563 = vmatprep.subr.mxu1 %v1610_v2 }
 0x20c   : > { %1564 = vmatpush3.msra.mxu1 %v1160_v25 }
 0x20d   : > { %1565 = vmatprep.subr.mxu1 %v1610_v2 }
 0x20e   : > { %1566 = vmatpush3.msra.mxu1 %v1159_v26 }
 0x20f   : > { %1567 = vmatprep.subr.mxu1 %v1610_v2 }
 0x210   : > { %1568 = vmatpush3.msra.mxu1 %v1158_v27 }
 0x211   : > { %1569 = vmatprep.subr.mxu1 %v1610_v2 }
 0x212   : > { %1570 = vmatpush3.msra.mxu1 %v1157_v28 }
 0x213   : > { %1571 = vmatprep.subr.mxu1 %v1610_v2 }
 0x214   : > { %1572 = vmatpush3.msra.mxu1 %v1156_v29 }
 0x215   : > { %1573 = vmatprep.subr.mxu1 %v1610_v2 }
 0x216   : > { %1574 = vmatpush3.msra.mxu1 %v1155_v30 }
 0x217   : > { %1575 = vmatprep.subr.mxu1 %v1610_v2 }
 0x218   : > { %1576 = vmatpush3.msra.mxu1 %v1154_v31 }
 0x219   : > { %1577 = vmatprep.subr.mxu1 %v1610_v2 }
 0x21a   : > { %1578 = vmatpush3.msra.mxu1 %v1153_v32 }
 0x21b   : > { %1579 = vmatprep.subr.mxu1 %v1610_v2 }
 0x21c   : > { %1580 = vmatpush3.msra.mxu1 %v1152_v33 }
 0x21d   : > { %1581 = vmatprep.subr.mxu1 %v1610_v2 }
 0x21e   : > { %1582 = vmatpush3.msra.mxu1 %v1151_v34 }
 0x21f   : > { %1584 = vmatmul.mubr.f32.vlgmr.msra.gmra.mxu1 %v922_v35 }
 0x2bf   : > { %v848_v36 = vpop.f32.mrf.mxu1 }
 0x2c1   : > { %v1515_v37 = vpop.f32.mrf.mxu1 }
 0x2c7   : > { %v918_v38 = vpop.f32.mrf.mxu0 }
 0x2c8   : > { %v919_v40 = vadd.f32 %v918_v38, %v848_v36 }
 0x2c9   : > { %v1550_v39 = vpop.f32.mrf.mxu0 }
 0x2df   : > { %v1006_v41 = vpop.f32.mrf.mxu1 }
 0x2e0   : > { %v1010_v43 = vadd.f32 %v1006_v41, %v919_v40 }
 0x2e1   : > { %v1585_v44 = vpop.f32.mrf.mxu1 }
 0x2e2   : > { %v1018_v45 = vadd.f32 %v1167_v42, %v1010_v43 }
 0x2e4   : > { %v1020_v46 = vmul.f32 0.70710677, %v1018_v45  ;;  %v1019_v47 = vmul.f32 0.5, %v1018_v45 }
 0x2e6   : > { %1600 = verf.f32 %v1020_v46 }
 0x2f3   : > { %v1601_v2 = vpop.eup %1600 }
 0x2f4   : > { %v1022_v48 = vadd.f32 1.0, %v1601_v2 }
 0x2f6   : > { %v1023_v49 = vmul.f32 %v1022_v48, %v1019_v47 }
 0x2f8   : > { %1024 = vst [vmem:[%s273_s10] sm:$0xff] %v1023_v49 }
 0x2f9 PF: > { %s17_s24 = sadd.s32 1, %s1608_s24  }
 0x2fa   : > { %p14_p4 = scmp.ge.s32.totalorder %s17_s24, 4  }
 0x2fc   :  { %16 = sbr.rel (!%p14_p4) target bundleno = 1 (0x1), region = 83 }

</bundles_post_ra>
